<compile_context>
chip_gen: v7x
topology: tpu7x:2x2x1
jax: 0.10.0
libtpu: 0.0.40
codegen_flags: <defaults>
</compile_context>

<pallas_src>
import jax
import jax.numpy as jnp
from jax.experimental import pallas as pl
from jax.experimental.pallas import tpu as pltpu

_CHUNK = 256  # lanes per inner compute chunk (multiple of 128)


def _bam_kernel(pos_ref, mask_ref, batch_ref, w1t_ref, b1_ref, w2_ref, b2_ref,
                node_e_ref, partial_e_ref, forces_ref):
    """One atom tile = `chunks_per_tile` lane-dense chunks of _CHUNK atoms.

    pos_ref:       (Ct, 3, C)  f32  positions, xyz on sublanes, atoms on lanes
    mask_ref:      (Ct, 1, C)  f32  local(1)/ghost(0) mask (0 on padded atoms)
    batch_ref:     (Ct, 1, C)  i32  graph index per atom (-1 on padded atoms)
    w1t_ref:       (H, 3)      f32
    b1_ref:        (H, 1)      f32
    w2_ref:        (H, 1)      f32
    b2_ref:        (1, 1)      f32  (SMEM)
    node_e_ref:    (Ct, 1, C)  f32
    partial_e_ref: (1, G, 1)   f32  per-tile per-graph partial energy
    forces_ref:    (Ct, 3, C)  f32
    """
    chunks_per_tile, _, chunk = pos_ref.shape
    n_graphs = partial_e_ref.shape[1]

    # Per-tile invariants, bound once (JAX does not CSE broadcast_in_dim).
    w1t = w1t_ref[...]                                   # (H, 3)
    w1x = w1t[:, 0:1]                                    # (H, 1)
    w1y = w1t[:, 1:2]
    w1z = w1t[:, 2:3]
    b1 = b1_ref[...]                                     # (H, 1)
    w2 = w2_ref[...]                                     # (H, 1)
    b2 = b2_ref[0, 0]                                    # scalar from SMEM
    gids = jax.lax.broadcasted_iota(jnp.int32, (n_graphs, chunk), 0)

    def chunk_body(c, acc):
        pos = pos_ref[c]                                 # (3, C)
        mask = mask_ref[c]                               # (1, C)
        batch = batch_ref[c]                             # (1, C) int32

        # ---- per-atom energy model: K=3 contraction unrolled on the VPU ----
        # (MXU would pad K=3 up to 128/256 and waste >95% of the array.)
        h = jnp.tanh(w1x * pos[0:1, :]
                     + w1y * pos[1:2, :]
                     + w1z * pos[2:3, :]
                     + b1)                               # (H, C)  VPU + EUP
        hw2 = h * w2                                     # (H, C)  reused fwd+bwd
        node_e = jnp.sum(hw2, axis=0, keepdims=True) + b2            # (1, C)
        node_e_ref[c] = node_e

        # ---- ghost/pad mask + per-graph partial scatter-sum -----------------
        e_local = node_e * mask                          # (1, C)
        # Padded atoms carry batch == -1, so they match no graph id here.
        # TODO(synk): for large graph counts (hundreds), replace this O(G*C)
        # one-hot reduction with PrefetchScalarGridSpec-carried per-tile graph
        # ranges (atoms sorted by graph) so each tile reduces only its graphs.
        contrib = jnp.where(batch == gids, e_local, 0.0)              # (G, C)
        acc = acc + jnp.sum(contrib, axis=1, keepdims=True)           # (G, 1)

        # ---- forces = -mask * d(node_e)/d(pos), analytic, rows stored direct
        grad_h = w2 - h * hw2                            # == (1 - h*h) * w2
        neg_mask = -mask
        forces_ref[c, 0:1, :] = neg_mask * jnp.sum(w1x * grad_h, axis=0,
                                                   keepdims=True)
        forces_ref[c, 1:2, :] = neg_mask * jnp.sum(w1y * grad_h, axis=0,
                                                   keepdims=True)
        forces_ref[c, 2:3, :] = neg_mask * jnp.sum(w1z * grad_h, axis=0,
                                                   keepdims=True)
        return acc

    acc0 = jnp.zeros((n_graphs, 1), jnp.float32)
    partial_e_ref[0] = jax.lax.fori_loop(0, chunks_per_tile, chunk_body, acc0,
                                         unroll=True)


def _choose_tile(n_atoms: int) -> int:
    # >= 2 tiles whenever the system exceeds one chunk so v7x's second
    # TensorCore gets work (the grid axis is "parallel"); each tile is a
    # multiple of the 256-lane inner chunk; the 4096 cap amortizes the
    # ~0.35 us per-grid-step overhead while keeping per-tile I/O tiny vs
    # scoped VMEM on all of v5e/v6e/v7x.
    target_tiles = 2 if n_atoms > _CHUNK else 1
    per_tile = pl.cdiv(n_atoms, target_tiles)
    tile = pl.cdiv(per_tile, _CHUNK) * _CHUNK
    return max(_CHUNK, min(tile, 4096))


def lammps_bam_forward(positions, local_or_ghost, batch, cell, params):
    """Pallas implementation of LAMMPS_BAM.forward (compute_virials=False).

    positions:       (N, 3)    float32
    local_or_ghost:  (N,)      float32 (0./1. mask)
    batch:           (N,)      int32   graph index per atom
    cell:            (G, 3, 3) float32
    params:          dict with w1 (3,H), b1 (H,), w2 (H,), b2 ()
    """
    n_atoms = positions.shape[0]
    n_graphs = cell.shape[0]
    hidden = params["w1"].shape[1]

    tile_n = _choose_tile(n_atoms)
    n_pad = pl.cdiv(n_atoms, tile_n) * tile_n
    num_tiles = n_pad // tile_n
    chunks_per_tile = tile_n // _CHUNK
    total_chunks = n_pad // _CHUNK
    pad = n_pad - n_atoms

    # Chunked, lane-dense layout: atoms on the lane axis, 256-atom chunks on a
    # leading axis so every (H, chunk) intermediate stays register-resident.
    pos_c = jnp.pad(positions.astype(jnp.float32).T, ((0, 0), (0, pad)))
    pos_c = pos_c.reshape(3, total_chunks, _CHUNK).transpose(1, 0, 2)       # (Ct,3,C)
    mask_c = jnp.pad(local_or_ghost.astype(jnp.float32), (0, pad)).reshape(
        total_chunks, 1, _CHUNK)                                            # (Ct,1,C)
    batch_c = jnp.pad(batch.astype(jnp.int32), (0, pad),
                      constant_values=-1).reshape(total_chunks, 1, _CHUNK)  # (Ct,1,C)

    w1t = params["w1"].astype(jnp.float32).T                       # (H, 3)
    b1 = params["b1"].astype(jnp.float32).reshape(hidden, 1)       # (H, 1)
    w2 = params["w2"].astype(jnp.float32).reshape(hidden, 1)       # (H, 1)
    b2 = params["b2"].astype(jnp.float32).reshape(1, 1)            # (1, 1) -> SMEM

    flops_per_atom = 8 * hidden + 8 * hidden + 3 * n_graphs
    cost = pl.CostEstimate(
        flops=int(n_pad * flops_per_atom),
        transcendentals=int(n_pad * hidden),
        bytes_accessed=int(4 * (9 * n_pad                 # pos+mask+batch+node_e+forces
                                + num_tiles * n_graphs
                                + 5 * hidden + 1)),
    )

    node_e, partial_e, forces_c = pl.pallas_call(
        _bam_kernel,
        out_shape=(
            jax.ShapeDtypeStruct((total_chunks, 1, _CHUNK), jnp.float32),   # node_energy
            jax.ShapeDtypeStruct((num_tiles, n_graphs, 1), jnp.float32),    # per-tile graph E
            jax.ShapeDtypeStruct((total_chunks, 3, _CHUNK), jnp.float32),   # forces (chunked)
        ),
        grid=(num_tiles,),
        in_specs=[
            pl.BlockSpec((chunks_per_tile, 3, _CHUNK), lambda t: (t, 0, 0)),
            pl.BlockSpec((chunks_per_tile, 1, _CHUNK), lambda t: (t, 0, 0)),
            pl.BlockSpec((chunks_per_tile, 1, _CHUNK), lambda t: (t, 0, 0)),
            pl.BlockSpec((hidden, 3), lambda t: (0, 0)),
            pl.BlockSpec((hidden, 1), lambda t: (0, 0)),
            pl.BlockSpec((hidden, 1), lambda t: (0, 0)),
            pl.BlockSpec(memory_space=pltpu.MemorySpace.SMEM),
        ],
        out_specs=(
            pl.BlockSpec((chunks_per_tile, 1, _CHUNK), lambda t: (t, 0, 0)),
            pl.BlockSpec((1, n_graphs, 1), lambda t: (t, 0, 0)),
            pl.BlockSpec((chunks_per_tile, 3, _CHUNK), lambda t: (t, 0, 0)),
        ),
        compiler_params=pltpu.CompilerParams(
            # Independent atom tiles -> megacore sharding on v7x.
            dimension_semantics=("parallel",),
        ),
        cost_estimate=cost,
    )(pos_c, mask_c, batch_c, w1t, b1, w2, b2)

    # Tiny cross-tile reduction stays outside the kernel so the atom-tile axis
    # can be "parallel" instead of a serialized in-kernel accumulator.
    total_e = jnp.sum(partial_e[:, :, 0], axis=0)                  # (G,)

    # node_energy for the padded tail is garbage by construction; it is sliced
    # off here and must never be read past n_atoms.
    node_energy = node_e.reshape(n_pad)[:n_atoms]                  # (N,)
    forces = forces_c.transpose(1, 0, 2).reshape(3, n_pad)[:, :n_atoms].T  # (N, 3)

    # TODO(synk): compute_virials=True branch needs d(total_E)/d(displacement);
    # the synthetic per-atom model has no displacement output, so virials stay zero.
    return {
        "total_energy_local": total_e,               # (G,)
        "node_energy": node_energy,                  # (N,)
        "forces": forces,                            # (N, 3)
        "virials": jnp.zeros_like(cell),             # (G, 3, 3) compute_virials=False
    }


def _reference_forward(positions, local_or_ghost, batch, cell, params, n_graphs):
    """Pure-JAX reference for correctness checking."""
    h = jnp.tanh(positions @ params["w1"] + params["b1"])
    node_e = h @ params["w2"] + params["b2"]                         # (N,)
    e_local = node_e * local_or_ghost
    total = jax.ops.segment_sum(e_local, batch, num_segments=n_graphs)
    grad_h = (1.0 - h * h) * params["w2"][None, :]
    forces = -local_or_ghost[:, None] * (grad_h @ params["w1"].T)
    return total, node_e, forces


if __name__ == "__main__":
    key = jax.random.PRNGKey(0)
    n_atoms, hidden, n_graphs = 16, 32, 2

    k_pos, k_w1, k_b1, k_w2 = jax.random.split(key, 4)
    positions = jax.random.normal(k_pos, (n_atoms, 3), dtype=jnp.float32)
    # half local atoms, half ghost atoms
    local_or_ghost = (jnp.arange(n_atoms) % 2 == 0).astype(jnp.float32)
    batch = (jnp.arange(n_atoms) // (n_atoms // n_graphs)).astype(jnp.int32)
    cell = jnp.tile(jnp.eye(3, dtype=jnp.float32)[None], (n_graphs, 1, 1))

    params = {
        "w1": 0.3 * jax.random.normal(k_w1, (3, hidden), dtype=jnp.float32),
        "b1": 0.1 * jax.random.normal(k_b1, (hidden,), dtype=jnp.float32),
        "w2": 0.2 * jax.random.normal(k_w2, (hidden,), dtype=jnp.float32),
        "b2": jnp.float32(-0.5),
    }

    out = jax.jit(lammps_bam_forward)(positions, local_or_ghost, batch, cell, params)
    jax.block_until_ready(out)

    ref_total, ref_node_e, ref_forces = _reference_forward(
        positions, local_or_ghost, batch, cell, params, n_graphs)

    assert jnp.allclose(out["total_energy_local"], ref_total, atol=1e-5, rtol=1e-5)
    assert jnp.allclose(out["node_energy"], ref_node_e, atol=1e-5, rtol=1e-5)
    assert jnp.allclose(out["forces"], ref_forces, atol=1e-5, rtol=1e-5)
    assert out["virials"].shape == (n_graphs, 3, 3)

    print("KERNEL_OK")
</pallas_src>

<mosaic_0001>
module attributes {stable_mosaic.version = 11 : i64} {
  func.func @_bam_kernel(%arg0: i32, %arg1: memref<1x3x256xf32, #tpu.memory_space<vmem>>, %arg2: memref<1x1x256xf32, #tpu.memory_space<vmem>>, %arg3: memref<1x1x256xi32, #tpu.memory_space<vmem>>, %arg4: memref<32x3xf32, #tpu.memory_space<vmem>>, %arg5: memref<32x1xf32, #tpu.memory_space<vmem>>, %arg6: memref<32x1xf32, #tpu.memory_space<vmem>>, %arg7: memref<1x1xf32, #tpu.memory_space<smem>>, %arg8: memref<1x1x256xf32, #tpu.memory_space<vmem>>, %arg9: memref<1x2x1xf32, #tpu.memory_space<vmem>>, %arg10: memref<1x3x256xf32, #tpu.memory_space<vmem>>) attributes {dimension_semantics = [#tpu.dimension_semantics<parallel>], iteration_bounds = array<i64: 1>, scalar_prefetch = 0 : i64, scratch_operands = 0 : i64, tpu.core_type = #tpu.core_type<tc>, window_params = [{transform_indices = @transform_0, window_bounds = array<i64: 1, 3, 256>}, {transform_indices = @transform_1, window_bounds = array<i64: 1, 1, 256>}, {transform_indices = @transform_2, window_bounds = array<i64: 1, 1, 256>}, {pipeline_mode = #tpu.pipeline_mode<synchronous>, transform_indices = @transform_3, window_bounds = array<i64: 32, 3>}, {pipeline_mode = #tpu.pipeline_mode<synchronous>, transform_indices = @transform_4, window_bounds = array<i64: 32, 1>}, {pipeline_mode = #tpu.pipeline_mode<synchronous>, transform_indices = @transform_5, window_bounds = array<i64: 32, 1>}, {transform_indices = @transform_6, window_bounds = array<i64: 1, 1>}, {transform_indices = @transform_7, window_bounds = array<i64: 1, 1, 256>}, {transform_indices = @transform_8, window_bounds = array<i64: 1, 2, 1>}, {transform_indices = @transform_9, window_bounds = array<i64: 1, 3, 256>}]} {
    %c0 = arith.constant 0 : index
    %c0_0 = arith.constant 0 : index
    %0 = vector.load %arg4[%c0, %c0_0] : memref<32x3xf32, #tpu.memory_space<vmem>>, vector<32x3xf32>
    %1 = vector.extract_strided_slice %0 {offsets = [0, 0], sizes = [32, 1], strides = [1, 1]} : vector<32x3xf32> to vector<32x1xf32>
    %2 = vector.extract_strided_slice %0 {offsets = [0, 1], sizes = [32, 1], strides = [1, 1]} : vector<32x3xf32> to vector<32x1xf32>
    %3 = vector.extract_strided_slice %0 {offsets = [0, 2], sizes = [32, 1], strides = [1, 1]} : vector<32x3xf32> to vector<32x1xf32>
    %c0_1 = arith.constant 0 : index
    %c0_2 = arith.constant 0 : index
    %4 = vector.load %arg5[%c0_1, %c0_2] : memref<32x1xf32, #tpu.memory_space<vmem>>, vector<32x1xf32>
    %c0_3 = arith.constant 0 : index
    %c0_4 = arith.constant 0 : index
    %5 = vector.load %arg6[%c0_3, %c0_4] : memref<32x1xf32, #tpu.memory_space<vmem>>, vector<32x1xf32>
    %c0_5 = arith.constant 0 : index
    %c0_6 = arith.constant 0 : index
    %6 = memref.load %arg7[%c0_5, %c0_6] : memref<1x1xf32, #tpu.memory_space<smem>>
    %7 = tpu.iota {dimensions = array<i32: 0>} : vector<2x256xi32>
    %cst = arith.constant 0.000000e+00 : f32
    %8 = vector.broadcast %cst : f32 to vector<2x1xf32>
    %c0_i32 = arith.constant 0 : i32
    %9 = arith.index_cast %c0_i32 : i32 to index
    %c0_7 = arith.constant 0 : index
    %c0_8 = arith.constant 0 : index
    %10 = vector.load %arg1[%9, %c0_7, %c0_8] : memref<1x3x256xf32, #tpu.memory_space<vmem>>, vector<1x3x256xf32>
    %11 = vector.shape_cast %10 : vector<1x3x256xf32> to vector<3x256xf32>
    %12 = arith.index_cast %c0_i32 : i32 to index
    %c0_9 = arith.constant 0 : index
    %c0_10 = arith.constant 0 : index
    %13 = vector.load %arg2[%12, %c0_9, %c0_10] : memref<1x1x256xf32, #tpu.memory_space<vmem>>, vector<1x1x256xf32>
    %14 = vector.shape_cast %13 : vector<1x1x256xf32> to vector<1x256xf32>
    %15 = arith.index_cast %c0_i32 : i32 to index
    %c0_11 = arith.constant 0 : index
    %c0_12 = arith.constant 0 : index
    %16 = vector.load %arg3[%15, %c0_11, %c0_12] : memref<1x1x256xi32, #tpu.memory_space<vmem>>, vector<1x1x256xi32>
    %17 = vector.shape_cast %16 : vector<1x1x256xi32> to vector<1x256xi32>
    %18 = vector.extract_strided_slice %11 {offsets = [0, 0], sizes = [1, 256], strides = [1, 1]} : vector<3x256xf32> to vector<1x256xf32>
    %19 = vector.broadcast %1 : vector<32x1xf32> to vector<32x256xf32>
    %20 = vector.broadcast %18 : vector<1x256xf32> to vector<32x256xf32>
    %21 = arith.mulf %19, %20 : vector<32x256xf32>
    %22 = vector.extract_strided_slice %11 {offsets = [1, 0], sizes = [1, 256], strides = [1, 1]} : vector<3x256xf32> to vector<1x256xf32>
    %23 = vector.broadcast %2 : vector<32x1xf32> to vector<32x256xf32>
    %24 = vector.broadcast %22 : vector<1x256xf32> to vector<32x256xf32>
    %25 = arith.mulf %23, %24 : vector<32x256xf32>
    %26 = arith.addf %21, %25 : vector<32x256xf32>
    %27 = vector.extract_strided_slice %11 {offsets = [2, 0], sizes = [1, 256], strides = [1, 1]} : vector<3x256xf32> to vector<1x256xf32>
    %28 = vector.broadcast %3 : vector<32x1xf32> to vector<32x256xf32>
    %29 = vector.broadcast %27 : vector<1x256xf32> to vector<32x256xf32>
    %30 = arith.mulf %28, %29 : vector<32x256xf32>
    %31 = arith.addf %26, %30 : vector<32x256xf32>
    %32 = vector.broadcast %4 : vector<32x1xf32> to vector<32x256xf32>
    %33 = arith.addf %31, %32 : vector<32x256xf32>
    %34 = math.tanh %33 : vector<32x256xf32>
    %35 = vector.broadcast %5 : vector<32x1xf32> to vector<32x256xf32>
    %36 = arith.mulf %34, %35 : vector<32x256xf32>
    %cst_13 = arith.constant dense<0.000000e+00> : vector<256xf32>
    %37 = vector.multi_reduction <add>, %36, %cst_13 [0] : vector<32x256xf32> to vector<256xf32>
    %38 = vector.shape_cast %37 : vector<256xf32> to vector<1x256xf32>
    %39 = vector.broadcast %6 : f32 to vector<1x256xf32>
    %40 = arith.addf %38, %39 : vector<1x256xf32>
    %41 = arith.index_cast %c0_i32 : i32 to index
    %c0_14 = arith.constant 0 : index
    %c0_15 = arith.constant 0 : index
    %42 = vector.load %arg8[%41, %c0_14, %c0_15] : memref<1x1x256xf32, #tpu.memory_space<vmem>>, vector<1x1x256xf32>
    %43 = vector.shape_cast %42 : vector<1x1x256xf32> to vector<1x256xf32>
    %44 = vector.shape_cast %40 : vector<1x256xf32> to vector<1x1x256xf32>
    tpu.vector_store %arg8[%41, %c0_14, %c0_15], %44 {strides = array<i32>} : memref<1x1x256xf32, #tpu.memory_space<vmem>>, vector<1x1x256xf32>,
    %45 = arith.mulf %40, %14 : vector<1x256xf32>
    %46 = vector.broadcast %17 : vector<1x256xi32> to vector<2x256xi32>
    %47 = arith.cmpi eq, %46, %7 : vector<2x256xi32>
    %cst_16 = arith.constant 0.000000e+00 : f32
    %48 = vector.shape_cast %45 : vector<1x256xf32> to vector<1x256xf32>
    %49 = vector.broadcast %48 : vector<1x256xf32> to vector<2x256xf32>
    %50 = vector.broadcast %cst_16 : f32 to vector<2x256xf32>
    %51 = arith.select %47, %49, %50 : vector<2x256xi1>, vector<2x256xf32>
    %cst_17 = arith.constant dense<0.000000e+00> : vector<2xf32>
    %52 = vector.multi_reduction <add>, %51, %cst_17 [1] : vector<2x256xf32> to vector<2xf32>
    %53 = vector.shape_cast %52 : vector<2xf32> to vector<2x1xf32>
    %54 = arith.addf %8, %53 : vector<2x1xf32>
    %55 = arith.mulf %34, %36 : vector<32x256xf32>
    %56 = vector.broadcast %5 : vector<32x1xf32> to vector<32x256xf32>
    %57 = arith.subf %56, %55 : vector<32x256xf32>
    %cst_18 = arith.constant 0.000000e+00 : f32
    %58 = vector.broadcast %cst_18 : f32 to vector<1x256xf32>
    %59 = arith.subf %58, %14 : vector<1x256xf32>
    %60 = vector.broadcast %1 : vector<32x1xf32> to vector<32x256xf32>
    %61 = arith.mulf %60, %57 : vector<32x256xf32>
    %cst_19 = arith.constant dense<0.000000e+00> : vector<256xf32>
    %62 = vector.multi_reduction <add>, %61, %cst_19 [0] : vector<32x256xf32> to vector<256xf32>
    %63 = vector.shape_cast %62 : vector<256xf32> to vector<1x256xf32>
    %64 = arith.mulf %59, %63 : vector<1x256xf32>
    %65 = arith.index_cast %c0_i32 : i32 to index
    %c0_20 = arith.constant 0 : index
    %c0_21 = arith.constant 0 : index
    %66 = vector.load %arg10[%65, %c0_20, %c0_21] : memref<1x3x256xf32, #tpu.memory_space<vmem>>, vector<1x1x256xf32>
    %67 = vector.shape_cast %66 : vector<1x1x256xf32> to vector<1x256xf32>
    %68 = vector.shape_cast %64 : vector<1x256xf32> to vector<1x1x256xf32>
    tpu.vector_store %arg10[%65, %c0_20, %c0_21], %68 {strides = array<i32>} : memref<1x3x256xf32, #tpu.memory_space<vmem>>, vector<1x1x256xf32>,
    %69 = vector.broadcast %2 : vector<32x1xf32> to vector<32x256xf32>
    %70 = arith.mulf %69, %57 : vector<32x256xf32>
    %cst_22 = arith.constant dense<0.000000e+00> : vector<256xf32>
    %71 = vector.multi_reduction <add>, %70, %cst_22 [0] : vector<32x256xf32> to vector<256xf32>
    %72 = vector.shape_cast %71 : vector<256xf32> to vector<1x256xf32>
    %73 = arith.mulf %59, %72 : vector<1x256xf32>
    %74 = arith.index_cast %c0_i32 : i32 to index
    %c1 = arith.constant 1 : index
    %c0_23 = arith.constant 0 : index
    %75 = vector.load %arg10[%74, %c1, %c0_23] : memref<1x3x256xf32, #tpu.memory_space<vmem>>, vector<1x1x256xf32>
    %76 = vector.shape_cast %75 : vector<1x1x256xf32> to vector<1x256xf32>
    %77 = vector.shape_cast %73 : vector<1x256xf32> to vector<1x1x256xf32>
    tpu.vector_store %arg10[%74, %c1, %c0_23], %77 {strides = array<i32>} : memref<1x3x256xf32, #tpu.memory_space<vmem>>, vector<1x1x256xf32>,
    %78 = vector.broadcast %3 : vector<32x1xf32> to vector<32x256xf32>
    %79 = arith.mulf %78, %57 : vector<32x256xf32>
    %cst_24 = arith.constant dense<0.000000e+00> : vector<256xf32>
    %80 = vector.multi_reduction <add>, %79, %cst_24 [0] : vector<32x256xf32> to vector<256xf32>
    %81 = vector.shape_cast %80 : vector<256xf32> to vector<1x256xf32>
    %82 = arith.mulf %59, %81 : vector<1x256xf32>
    %83 = arith.index_cast %c0_i32 : i32 to index
    %c2 = arith.constant 2 : index
    %c0_25 = arith.constant 0 : index
    %84 = vector.load %arg10[%83, %c2, %c0_25] : memref<1x3x256xf32, #tpu.memory_space<vmem>>, vector<1x1x256xf32>
    %85 = vector.shape_cast %84 : vector<1x1x256xf32> to vector<1x256xf32>
    %86 = vector.shape_cast %82 : vector<1x256xf32> to vector<1x1x256xf32>
    tpu.vector_store %arg10[%83, %c2, %c0_25], %86 {strides = array<i32>} : memref<1x3x256xf32, #tpu.memory_space<vmem>>, vector<1x1x256xf32>,
    %c1_i32 = arith.constant 1 : i32
    %c0_26 = arith.constant 0 : index
    %c0_27 = arith.constant 0 : index
    %c0_28 = arith.constant 0 : index
    %87 = vector.load %arg9[%c0_26, %c0_27, %c0_28] : memref<1x2x1xf32, #tpu.memory_space<vmem>>, vector<1x2x1xf32>
    %88 = vector.shape_cast %87 : vector<1x2x1xf32> to vector<2x1xf32>
    %89 = vector.shape_cast %54 : vector<2x1xf32> to vector<1x2x1xf32>
    tpu.vector_store %arg9[%c0_26, %c0_27, %c0_28], %89 {strides = array<i32>} : memref<1x2x1xf32, #tpu.memory_space<vmem>>, vector<1x2x1xf32>,
    return
  }
  func.func @transform_0(%arg0: i32) -> (i32, i32, i32) {
    %c0_i32 = arith.constant 0 : i32
    %c0_i32_0 = arith.constant 0 : i32
    %c0_i32_1 = arith.constant 0 : i32
    return %arg0, %c0_i32, %c0_i32_0 : i32, i32, i32
  }
  func.func @transform_1(%arg0: i32) -> (i32, i32, i32) {
    %c0_i32 = arith.constant 0 : i32
    %c0_i32_0 = arith.constant 0 : i32
    %c0_i32_1 = arith.constant 0 : i32
    return %arg0, %c0_i32, %c0_i32_0 : i32, i32, i32
  }
  func.func @transform_2(%arg0: i32) -> (i32, i32, i32) {
    %c0_i32 = arith.constant 0 : i32
    %c0_i32_0 = arith.constant 0 : i32
    %c0_i32_1 = arith.constant 0 : i32
    return %arg0, %c0_i32, %c0_i32_0 : i32, i32, i32
  }
  func.func @transform_3(%arg0: i32) -> (i32, i32) {
    %c0_i32 = arith.constant 0 : i32
    %c0_i32_0 = arith.constant 0 : i32
    %c0_i32_1 = arith.constant 0 : i32
    return %c0_i32, %c0_i32_0 : i32, i32
  }
  func.func @transform_4(%arg0: i32) -> (i32, i32) {
    %c0_i32 = arith.constant 0 : i32
    %c0_i32_0 = arith.constant 0 : i32
    %c0_i32_1 = arith.constant 0 : i32
    return %c0_i32, %c0_i32_0 : i32, i32
  }
  func.func @transform_5(%arg0: i32) -> (i32, i32) {
    %c0_i32 = arith.constant 0 : i32
    %c0_i32_0 = arith.constant 0 : i32
    %c0_i32_1 = arith.constant 0 : i32
    return %c0_i32, %c0_i32_0 : i32, i32
  }
  func.func @transform_6(%arg0: i32) -> (i32, i32) {
    %c0_i32 = arith.constant 0 : i32
    %c0_i32_0 = arith.constant 0 : i32
    %c0_i32_1 = arith.constant 0 : i32
    return %c0_i32, %c0_i32_0 : i32, i32
  }
  func.func @transform_7(%arg0: i32) -> (i32, i32, i32) {
    %c0_i32 = arith.constant 0 : i32
    %c0_i32_0 = arith.constant 0 : i32
    %c0_i32_1 = arith.constant 0 : i32
    return %arg0, %c0_i32, %c0_i32_0 : i32, i32, i32
  }
  func.func @transform_8(%arg0: i32) -> (i32, i32, i32) {
    %c0_i32 = arith.constant 0 : i32
    %c0_i32_0 = arith.constant 0 : i32
    %c0_i32_1 = arith.constant 0 : i32
    return %arg0, %c0_i32, %c0_i32_0 : i32, i32, i32
  }
  func.func @transform_9(%arg0: i32) -> (i32, i32, i32) {
    %c0_i32 = arith.constant 0 : i32
    %c0_i32_0 = arith.constant 0 : i32
    %c0_i32_1 = arith.constant 0 : i32
    return %arg0, %c0_i32, %c0_i32_0 : i32, i32, i32
  }
}

</mosaic_0001>

<bundles_post_ra>
// kernel: lammps_bam_forward.1
= control target key start
LH: loop header
LB: loop body
LE: loop exit
PB: predicated region body
PF: predicated region fallthrough
CT: control target
= control target key end

     0   :  { %v544_v0 = vmov 2   ;;  %v545_v1 = vmov 1   ;;  %v546_v6 = vmov 0   ;;  %v43_v15 = vlaneseq  ;;  %s815_s3 = inlined_call_operand.vmem [shape: f32[32,3], index: 3, kind: input, shape index: {}]   ;;  %s816_s4 = inlined_call_operand.vmem [shape: f32[32,1], index: 4, kind: input, shape index: {}]   ;;  %s817_s5 = inlined_call_operand.vmem [shape: f32[32,1], index: 5, kind: input, shape index: {}]   ;;  %s818_s0 = inlined_call_operand.vmem [shape: f32[1,3,256], index: 0, kind: input, shape index: {}]   ;;  %s819_s1 = inlined_call_operand.vmem [shape: f32[1,1,256], index: 1, kind: input, shape index: {}]   ;;  %s820_s2 = inlined_call_operand.vmem [shape: s32[1,1,256], index: 2, kind: input, shape index: {}]   ;;  %s821_s6 = inlined_call_operand.<no memory space> [shape: f32[1,1], index: 6, kind: input, shape index: {}]   ;;  %s822_s7 = inlined_call_operand.vmem [shape: f32[1,1,256], index: 7, kind: output, shape index: {0}]   ;;  %s823_s9 = inlined_call_operand.vmem [shape: f32[1,3,256], index: 9, kind: output, shape index: {2}]   ;;  %s824_s8 = inlined_call_operand.vmem [shape: f32[1,2,1], index: 8, kind: output, shape index: {1}]  }
   0x1   :  { %521 = vset.pattern.permute.xlu0 %v544_v0  ;;  %520 = vset.pattern.permute.xlu1 %v545_v1  ;;  %v30_v2 = vld [vmem:[%s815_s3] sm:$0xff]  ;;  %v31_v3 = vld [vmem:[%s815_s3 + $0x8] sm:$0xff]  ;;  %v33_v4 = vld [vmem:[%s815_s3 + $0x18] sm:$0xff]  ;;  %vm336_vm2 = vcmask 1041408   ;;  %vm500_vm4 = vcmask 1024  }
   0x2   :  { %146 = vperm.xlu0 %521, %v30_v2   ;;  %96 = vperm.xlu1 %520, %v30_v2   ;;  %v32_v5 = vld [vmem:[%s815_s3 + $0x10] sm:$0xff]  ;;  %v34_v7 = vld [vmem:[%s816_s4] sm:$0xff]  ;;  %v37_v8 = vld [vmem:[%s816_s4 + $0x18] sm:$0xff]  ;;  %v639_v18 = vshrl.u32 %v43_v15, 7  ;;  %vm300_vm3 = vcmp.lt.s32.totalorder %v43_v15, 256 }
   0x3   :  { %v39_v9 = vld [vmem:[%s817_s5 + $0x8] sm:$0xff]  ;;  %v41_v11 = vld [vmem:[%s817_s5 + $0x18] sm:$0xff]  ;;  %v36_v12 = vld [vmem:[%s816_s4 + $0x10] sm:$0xff] }
   0x4   :  { %v35_v10 = vld [vmem:[%s816_s4 + $0x8] sm:$0xff]  ;;  %v38_v13 = vld [vmem:[%s817_s5] sm:$0xff]  ;;  %v40_v14 = vld [vmem:[%s817_s5 + $0x10] sm:$0xff]  ;;  %v642_v19 = vsub.s32 0, %v639_v18  ;;  %v75_v21 = vsub.s32 4, %v639_v18  ;;  %v648_v22 = vsub.s32 1, %v639_v18 }
   0x5   :  { %v117_v24 = vsub.s32 5, %v639_v18  ;;  %v45_v25 = vld [vmem:[%s818_s0] sm:$0x77]  ;;  %v163_v27 = vsub.s32 2, %v639_v18  ;;  %v167_v30 = vsub.s32 6, %v639_v18 }
   0x6   :  { %524 = vset.pattern.permute.xlu0 %v545_v1  ;;  %100 = vperm.xlu1 %520, %v31_v3   ;;  %v72_v26 = vrot.slane %v45_v25, %v642_v19  ;;  %v76_v29 = vrot.slane %v45_v25, %v75_v21  ;;  %v114_v31 = vrot.slane %v45_v25, %v648_v22 }
   0x7   :  { %108 = vperm.xlu0 %524, %v33_v4   ;;  %v118_v32 = vrot.slane %v45_v25, %v117_v24  ;;  %v164_v35 = vrot.slane %v45_v25, %v163_v27  ;;  %v168_v37 = vrot.slane %v45_v25, %v167_v30 }
   0x8   :  { %v82_v34 = vrot.slane %v72_v26, %v642_v19  ;;  %v86_v36 = vrot.slane %v76_v29, %v642_v19  ;;  %v124_v38 = vrot.slane %v114_v31, %v648_v22 }
   0x9   :  { %v128_v40 = vrot.slane %v118_v32, %v648_v22  ;;  %v174_v43 = vrot.slane %v164_v35, %v163_v27  ;;  %v178_v45 = vrot.slane %v168_v37, %v163_v27 }
   0xa   :  { %104 = vperm.xlu1 %520, %v32_v5  }
   0xb   :  { %525 = vset.pattern.permute.xlu0 %v546_v6 }
   0xc   :  { %50 = vperm.xlu0 %525, %v30_v2  }
   0xe   :  { %522 = vset.pattern.permute.xlu1 %v544_v0 }
   0xf   :  { %150 = vperm.xlu1 %522, %v31_v3  }
  0x10   :  { %55 = vperm.xlu0 %525, %v31_v3  }
  0x13   :  { %523 = vset.pattern.permute.xlu1 %v546_v6 }
  0x14   :  { %60 = vperm.xlu0 %525, %v32_v5   ;;  %65 = vperm.xlu1 %523, %v33_v4  }
  0x18   :  { %197 = vperm.xlu0 %525, %v34_v7   ;;  %526 = vset.pattern.permute.xlu1 %v544_v0 }
  0x19   :  { %154 = vperm.xlu1 %526, %v32_v5  }
  0x1c   :  { %212 = vperm.xlu0 %525, %v37_v8  }
  0x1d   :  { %158 = vperm.xlu1 %526, %v33_v4  }
  0x20   :  { %238 = vperm.xlu0 %525, %v39_v9  }
  0x21   :  { %527 = vset.pattern.permute.xlu1 %v546_v6 }
  0x22   :  { %202 = vperm.xlu1 %527, %v35_v10  }
  0x24   :  { %248 = vperm.xlu0 %525, %v41_v11  }
  0x26   :  { %207 = vperm.xlu1 %527, %v36_v12  }
  0x2a   :  { %233 = vperm.xlu1 %527, %v38_v13  }
  0x2e   :  { %243 = vperm.xlu1 %527, %v40_v14  }
  0x81   :  { %v634_v16 = vpop.permute.xlu1 %96  ;;  %v636_v17 = vpop.permute.xlu0 %146 }
  0x82   :  { %v129_v46 = vmul.f32 %v124_v38, %v634_v16  ;;  %v130_v47 = vmul.f32 %v128_v40, %v634_v16  ;;  %v179_v51 = vmul.f32 %v174_v43, %v636_v17  ;;  %v180_v53 = vmul.f32 %v178_v45, %v636_v17 }
  0x85   :  { %v644_v20 = vpop.permute.xlu1 %100 }
  0x86   :  { %v650_v23 = vpop.permute.xlu0 %108  ;;  %v131_v0 = vmul.f32 %v124_v38, %v644_v20  ;;  %v132_v1 = vmul.f32 %v128_v40, %v644_v20 }
  0x87   :  { %v135_v55 = vmul.f32 %v124_v38, %v650_v23  ;;  %v136_v60 = vmul.f32 %v128_v40, %v650_v23 }
  0x89   :  { %v658_v28 = vpop.permute.xlu1 %104 }
  0x8a   :  { %v133_v4 = vmul.f32 %v124_v38, %v658_v28  ;;  %v134_v24 = vmul.f32 %v128_v40, %v658_v28 }
  0x8b   :  { %v662_v33 = vpop.permute.xlu0 %50 }
  0x8c   :  { %v87_v42 = vmul.f32 %v82_v34, %v662_v33  ;;  %v88_v44 = vmul.f32 %v86_v36, %v662_v33 }
  0x8e   :  { %v667_v39 = vpop.permute.xlu1 %150  ;;  %v137_v50 = vadd.f32 %v129_v46, %v87_v42  ;;  %v138_v52 = vadd.f32 %v130_v47, %v88_v44 }
  0x8f   :  { %v670_v41 = vpop.permute.xlu0 %55  ;;  %v181_v8 = vmul.f32 %v174_v43, %v667_v39  ;;  %v182_v21 = vmul.f32 %v178_v45, %v667_v39 }
  0x90   :  { %v89_v56 = vmul.f32 %v82_v34, %v670_v41  ;;  %v90_v57 = vmul.f32 %v86_v36, %v670_v41  ;;  %v187_v58 = vadd.f32 %v179_v51, %v137_v50  ;;  %v188_v63 = vadd.f32 %v180_v53, %v138_v52 }
  0x92   :  { %v139_v6 = vadd.f32 %v131_v0, %v89_v56  ;;  %v140_v7 = vadd.f32 %v132_v1, %v90_v57  ;;  %v547_v56 = vmov 1966171168   ;;  %v707_v1 = vld [vmem:[%s819_s1] sm:$0x3] }
  0x93   :  { %v676_v48 = vpop.permute.xlu0 %60  ;;  %v678_v49 = vpop.permute.xlu1 %65  ;;  %v284_v57 = vunpack.c.l.s4 %v547_v56 }
  0x94   :  { %v93_v61 = vmul.f32 %v82_v34, %v678_v49  ;;  %v94_v62 = vmul.f32 %v86_v36, %v678_v49  ;;  %v91_v13 = vmul.f32 %v82_v34, %v676_v48  ;;  %v92_v14 = vmul.f32 %v86_v36, %v676_v48 }
  0x95   :  { %v189_v29 = vadd.f32 %v181_v8, %v139_v6  ;;  %v190_v30 = vadd.f32 %v182_v21, %v140_v7  ;;  %v307_v21 = vrot.slane %v707_v1, %v642_v19 }
  0x96   :  { %v143_v9 = vadd.f32 %v135_v55, %v93_v61  ;;  %v144_v10 = vadd.f32 %v136_v60, %v94_v62  ;;  %v141_v42 = vadd.f32 %v133_v4, %v91_v13  ;;  %v142_v44 = vadd.f32 %v134_v24, %v92_v14 }
  0x97   :  { %v198_v54 = vpop.permute.xlu0 %197  ;;  %v277_v14 = vstv %s821_s6 }
  0x98   :  { %v685_v59 = vpop.permute.xlu1 %154  ;;  %v215_v2 = vadd.f32 %v198_v54, %v187_v58  ;;  %v216_v3 = vadd.f32 %v198_v54, %v188_v63 }
  0x99   :  { %v183_v31 = vmul.f32 %v174_v43, %v685_v59  ;;  %v184_v32 = vmul.f32 %v178_v45, %v685_v59 }
  0x9a   :  { %528 = vtanh.f32 %v215_v2  ;;  %v285_v2 = vunpack.c.0.s8 %v284_v57 }
  0x9b   :  { %530 = vtanh.f32 %v216_v3  ;;  %v213_v27 = vpop.permute.xlu0 %212  ;;  %v191_v40 = vadd.f32 %v183_v31, %v141_v42  ;;  %v192_v46 = vadd.f32 %v184_v32, %v142_v44 }
  0x9c   :  { %v693_v5 = vpop.permute.xlu1 %158 }
  0x9d   :  { %v185_v11 = vmul.f32 %v174_v43, %v693_v5  ;;  %v186_v12 = vmul.f32 %v178_v45, %v693_v5 }
  0x9f   :  { %v193_v25 = vadd.f32 %v185_v11, %v143_v9  ;;  %v194_v26 = vadd.f32 %v186_v12, %v144_v10  ;;  %v239_v52 = vpop.permute.xlu0 %238  ;;  %v712_v11 = vld [vmem:[%s820_s2] sm:$0x3] }
  0xa0   :  { %v319_v32 = vrot.slane %v712_v11, %v642_v19 }
  0xa1   :  { %v221_v35 = vadd.f32 %v213_v27, %v193_v25  ;;  %v222_v37 = vadd.f32 %v213_v27, %v194_v26  ;;  %v203_v34 = vpop.permute.xlu1 %202  ;;  %v720_v26 = vsub.s32 %v285_v2, %v639_v18  ;;  %v311_v27 = vrot.slane %v707_v1, %v648_v22 }
  0xa2   :  { %v217_v38 = vadd.f32 %v203_v34, %v189_v29  ;;  %v218_v36 = vadd.f32 %v203_v34, %v190_v30  ;;  %vm756_vm0 = vcmp.eq.s32.totalorder %v319_v32, %v639_v18 }
  0xa3   :  { %532 = vtanh.f32 %v221_v35  ;;  %v249_v62 = vpop.permute.xlu0 %248  ;;  %v323_v35 = vrot.slane %v712_v11, %v648_v22 }
  0xa4   :  { %534 = vtanh.f32 %v222_v37  ;;  %v529_v43 = vpop.eup %528 }
  0xa5   :  { %536 = vtanh.f32 %v217_v38  ;;  %v208_v47 = vpop.permute.xlu1 %207  ;;  %v531_v53 = vpop.eup %530  ;;  %vm764_vm1 = vcmp.eq.s32.totalorder %v323_v35, %v639_v18 }
  0xa6   :  { %538 = vtanh.f32 %v218_v36  ;;  %v219_v50 = vadd.f32 %v208_v47, %v191_v40  ;;  %v220_v51 = vadd.f32 %v208_v47, %v192_v46 }
  0xa8   :  { %540 = vtanh.f32 %v219_v50 }
  0xa9   :  { %v234_v45 = vpop.permute.xlu1 %233  ;;  %542 = vtanh.f32 %v220_v51 }
  0xaa   :  { %v251_v54 = vmul.f32 %v529_v43, %v234_v45  ;;  %v252_v55 = vmul.f32 %v531_v53, %v234_v45 }
  0xac   :  { %v343_v58 = vmul.f32 %v529_v43, %v251_v54  ;;  %v344_v60 = vmul.f32 %v531_v53, %v252_v55 }
  0xad   :  { %v533_v61 = vpop.eup %532  ;;  %v244_v50 = vpop.permute.xlu1 %243 }
  0xae   :  { %v535_v63 = vpop.eup %534  ;;  %v257_v0 = vmul.f32 %v533_v61, %v249_v62  ;;  %v351_v6 = vsub.f32 %v234_v45, %v343_v58  ;;  %v352_v10 = vsub.f32 %v234_v45, %v344_v60 }
  0xaf   :  { %v537_v3 = vpop.eup %536  ;;  %v258_v4 = vmul.f32 %v535_v63, %v249_v62 }
  0xb0   :  { %v539_v7 = vpop.eup %538  ;;  %v349_v8 = vmul.f32 %v533_v61, %v257_v0  ;;  %v253_v9 = vmul.f32 %v537_v3, %v239_v52  ;;  %v360_v31 = vmul.f32 %v351_v6, %v662_v33  ;;  %v361_v36 = vmul.f32 %v352_v10, %v662_v33 }
  0xb1   :  { %v350_v12 = vmul.f32 %v535_v63, %v258_v4  ;;  %v254_v13 = vmul.f32 %v539_v7, %v239_v52  ;;  %v406_v42 = vmul.f32 %v351_v6, %v634_v16  ;;  %v407_v46 = vmul.f32 %v352_v10, %v634_v16 }
  0xb2   :  { %v357_v24 = vsub.f32 %v249_v62, %v349_v8  ;;  %v345_v25 = vmul.f32 %v537_v3, %v253_v9  ;;  %v541_v29 = vpop.eup %540  ;;  %v259_v44 = vadd.f32 %v253_v9, %v251_v54  ;;  %v453_v47 = vmul.f32 %v351_v6, %v636_v17 }
  0xb3   :  { %v346_v30 = vmul.f32 %v539_v7, %v254_v13  ;;  %v543_v37 = vpop.eup %542  ;;  %v358_v34 = vsub.f32 %v249_v62, %v350_v12  ;;  %v268_v43 = vadd.f32 %v254_v13, %v252_v55  ;;  %v454_v53 = vmul.f32 %v352_v10, %v636_v17 }
  0xb4   :  { %v353_v38 = vsub.f32 %v239_v52, %v345_v25  ;;  %v366_v51 = vmul.f32 %v357_v24, %v678_v49  ;;  %v255_v45 = vmul.f32 %v541_v29, %v244_v50  ;;  %v412_v56 = vmul.f32 %v357_v24, %v650_v23 }
  0xb5   :  { %v354_v40 = vsub.f32 %v239_v52, %v346_v30  ;;  %v256_v58 = vmul.f32 %v543_v37, %v244_v50  ;;  %v367_v52 = vmul.f32 %v358_v34, %v678_v49  ;;  %v459_v16 = vmul.f32 %v357_v24, %v693_v5 }
  0xb6   :  { %v362_v57 = vmul.f32 %v353_v38, %v670_v41  ;;  %v408_v33 = vmul.f32 %v353_v38, %v644_v20  ;;  %v455_v54 = vmul.f32 %v353_v38, %v667_v39  ;;  %v260_v60 = vadd.f32 %v259_v44, %v255_v45 }
  0xb7   :  { %v363_v61 = vmul.f32 %v354_v40, %v670_v41  ;;  %v409_v55 = vmul.f32 %v354_v40, %v644_v20  ;;  %v456_v17 = vmul.f32 %v354_v40, %v667_v39  ;;  %v269_v62 = vadd.f32 %v268_v43, %v256_v58 }
  0xb8   :  { %v413_v63 = vmul.f32 %v358_v34, %v650_v23  ;;  %v261_v2 = vadd.f32 %v260_v60, %v257_v0  ;;  %v347_v3 = vmul.f32 %v541_v29, %v255_v45  ;;  %v348_v6 = vmul.f32 %v543_v37, %v256_v58 }
  0xb9   :  { %v460_v7 = vmul.f32 %v358_v34, %v693_v5  ;;  %v368_v49 = vadd.f32 %v362_v57, %v360_v31  ;;  %v414_v8 = vadd.f32 %v408_v33, %v406_v42  ;;  %v270_v9 = vadd.f32 %v269_v62, %v258_v4 }
  0xba   :  { %v461_v10 = vadd.f32 %v455_v54, %v453_v47  ;;  %v262_v12 = vrot.slane %v261_v2, 4  ;;  %v355_v13 = vsub.f32 %v244_v50, %v347_v3  ;;  %v356_v24 = vsub.f32 %v244_v50, %v348_v6 }
  0xbb   :  { %v377_v41 = vadd.f32 %v363_v61, %v361_v36  ;;  %v423_v25 = vadd.f32 %v409_v55, %v407_v46  ;;  %v470_v20 = vadd.f32 %v456_v17, %v454_v53  ;;  %v271_v30 = vrot.slane %v270_v9, 4 }
  0xbc   :  { %v263_v39 = vadd.f32 %v262_v12, %v261_v2  ;;  %v364_v38 = vmul.f32 %v355_v13, %v676_v48  ;;  %v365_v23 = vmul.f32 %v356_v24, %v676_v48  ;;  %v410_v0 = vmul.f32 %v355_v13, %v658_v28 }
  0xbd   :  { %v272_v29 = vadd.f32 %v271_v30, %v270_v9  ;;  %v411_v5 = vmul.f32 %v356_v24, %v658_v28  ;;  %v457_v4 = vmul.f32 %v355_v13, %v685_v59  ;;  %v458_v31 = vmul.f32 %v356_v24, %v685_v59 }
  0xbe   :  { %v264_v37 = vrot.slane %v263_v39, 2  ;;  %v369_v34 = vadd.f32 %v368_v49, %v364_v38  ;;  %v378_v36 = vadd.f32 %v377_v41, %v365_v23  ;;  %v415_v42 = vadd.f32 %v414_v8, %v410_v0 }
  0xbf   :  { %v273_v44 = vrot.slane %v272_v29, 2  ;;  %v424_v40 = vadd.f32 %v423_v25, %v411_v5  ;;  %v462_v46 = vadd.f32 %v461_v10, %v457_v4  ;;  %v471_v47 = vadd.f32 %v470_v20, %v458_v31 }
  0xc0   :  { %v370_v50 = vadd.f32 %v369_v34, %v366_v51  ;;  %v379_v43 = vadd.f32 %v378_v36, %v367_v52  ;;  %v416_v48 = vadd.f32 %v415_v42, %v412_v56  ;;  %v265_v53 = vadd.f32 %v264_v37, %v263_v39 }
  0xc1   :  { %v425_v45 = vadd.f32 %v424_v40, %v413_v63  ;;  %v463_v57 = vadd.f32 %v462_v46, %v459_v16  ;;  %v472_v33 = vadd.f32 %v471_v47, %v460_v7  ;;  %v274_v28 = vadd.f32 %v273_v44, %v272_v29 }
  0xc2   :  { %v371_v58 = vrot.slane %v370_v50, 4  ;;  %v380_v54 = vrot.slane %v379_v43, 4  ;;  %v417_v60 = vrot.slane %v416_v48, 4  ;;  %v266_v61 = vrot.slane %v265_v53, 1 }
  0xc3   :  { %v426_v56 = vrot.slane %v425_v45, 4  ;;  %v464_v52 = vrot.slane %v463_v57, 4  ;;  %v473_v16 = vrot.slane %v472_v33, 4  ;;  %v275_v55 = vrot.slane %v274_v28, 1 }
  0xc4   :  { %v372_v32 = vadd.f32 %v371_v58, %v370_v50  ;;  %v381_v17 = vadd.f32 %v380_v54, %v379_v43  ;;  %v418_v62 = vadd.f32 %v417_v60, %v416_v48  ;;  %v267_v63 = vadd.f32 %v266_v61, %v265_v53 }
  0xc5   :  { %v427_v2 = vadd.f32 %v426_v56, %v425_v45  ;;  %v465_v3 = vadd.f32 %v464_v52, %v463_v57  ;;  %v474_v6 = vadd.f32 %v473_v16, %v472_v33  ;;  %v276_v7 = vadd.f32 %v275_v55, %v274_v28 }
  0xc6   :  { %v373_v49 = vrot.slane %v372_v32, 2  ;;  %v382_v8 = vrot.slane %v381_v17, 2  ;;  %v419_v11 = vrot.slane %v418_v62, 2  ;;  %v278_v18 = vadd.f32 %v277_v14, %v267_v63 }
  0xc7   :  { %v428_v35 = vrot.slane %v427_v2, 2  ;;  %v466_v9 = vrot.slane %v465_v3, 2  ;;  %v475_v10 = vrot.slane %v474_v6, 2  ;;  %v279_v12 = vadd.f32 %v277_v14, %v276_v7 }
  0xc8   :  { %v374_v13 = vadd.f32 %v373_v49, %v372_v32  ;;  %v383_v24 = vadd.f32 %v382_v8, %v381_v17  ;;  %v420_v41 = vadd.f32 %v419_v11, %v418_v62  ;;  %v314_v25 = vmul.f32 %v307_v21, %v278_v18 }
  0xc9   :  { %v429_v20 = vadd.f32 %v428_v35, %v427_v2  ;;  %v467_v30 = vadd.f32 %v466_v9, %v465_v3  ;;  %v476_v39 = vadd.f32 %v475_v10, %v474_v6  ;;  %v315_v38 = vmul.f32 %v311_v27, %v279_v12 }
  0xca   :  { %v375_v23 = vrot.slane %v374_v13, 1  ;;  %v384_v0 = vrot.slane %v383_v24, 1  ;;  %v421_v29 = vrot.slane %v420_v41, 1  ;;  %v329_v5 = vrot.slane %v314_v25, %v642_v19 }
  0xcb   :  { %v430_v14 = vrot.slane %v429_v20, 1  ;;  %v468_v4 = vrot.slane %v467_v30, 1  ;;  %v477_v31 = vrot.slane %v476_v39, 1  ;;  %v333_v37 = vrot.slane %v315_v38, %v642_v19 }
  0xcc   :  { %v376_v34 = vadd.f32 %v375_v23, %v374_v13  ;;  %v385_v36 = vadd.f32 %v384_v0, %v383_v24  ;;  %v422_v21 = vadd.f32 %v421_v29, %v420_v41  ;;  %v334_v42 = vsel %vm756_vm0, %v329_v5, 0.0 }
  0xcd   :  { %v431_v44 = vadd.f32 %v430_v14, %v429_v20  ;;  %v469_v40 = vadd.f32 %v468_v4, %v467_v30  ;;  %v478_v22 = vadd.f32 %v477_v31, %v476_v39  ;;  %v335_v27 = vsel %vm764_vm1, %v333_v37, 0.0 }
  0xce   :  { %v388_v46 = vcombine.low %v376_v34, %v385_v36  ;;  %v337_v47 = vsel %vm336_vm2, %v334_v42, 0.0  ;;  %v338_v50 = vsel %vm336_vm2, %v335_v27, 0.0  ;;  %v282_v43 = vcombine.low %v278_v18, %v279_v12 }
  0xcf   :  { %v434_v48 = vcombine.low %v422_v21, %v431_v44  ;;  %v481_v19 = vcombine.low %v469_v40, %v478_v22  ;;  %v339_v53 = vadd.f32 %v338_v50, %v337_v47  ;;  %v359_v45 = vsub.f32 0.0, %v707_v1 }
  0xd0   :  { %v395_v57 = vrot.slane %v388_v46, %v720_v26  ;;  %v289_v33 = vrot.slane %v282_v43, %v720_v26 }
  0xd1   :  { %v441_v28 = vrot.slane %v434_v48, %v720_v26  ;;  %v488_v59 = vrot.slane %v481_v19, %v720_v26  ;;  %340 = vadd.xlane.f32.xlu1 %v339_v53 }
  0xd2   :  { %v402_v58 = vrot.slane %v395_v57, %v720_v26  ;;  %v296_v54 = vrot.slane %v289_v33, %v720_v26 }
  0xd3   :  { %v448_v60 = vrot.slane %v441_v28, %v720_v26  ;;  %v495_v61 = vrot.slane %v488_v59, %v720_v26 }
  0xd4   :  { %v404_v1 = vmul.f32 %v402_v58, %v359_v45  ;;  %302 = vst.msk [vmem:[%s822_s7] sm:$0x3] %vm300_vm3, %v296_v54 }
  0xd5   :  { %v450_v51 = vmul.f32 %v448_v60, %v359_v45  ;;  %v497_v15 = vmul.f32 %v495_v61, %v359_v45 }
  0xd6   :  { %405 = vst.msk [vmem:[%s823_s9] ss:$4 sm:$0x3] %vm300_vm3, %v404_v1 }
  0xd7   :  { %514 = vst.msk [vmem:[%s823_s9 + $0x1] ss:$4 sm:$0x3] %vm300_vm3, %v450_v51  ;;  %515 = vst.msk [vmem:[%s823_s9 + $0x2] ss:$4 sm:$0x3] %vm300_vm3, %v497_v15 }
 0x15e   :  { %v341_v26 = vpop.xlane.xlu1 %340 }
 0x15f   :  { %501 = vst.msk [vmem:[%s824_s8] sm:$0x3] %vm500_vm4, %v341_v26 }

</bundles_post_ra>
